<compile_context>
chip_gen: v7x
topology: tpu7x:2x2x1
jax: 0.10.0
libtpu: 0.0.40
codegen_flags: <defaults>
</compile_context>

<pallas_src>
import math
import functools

import jax
import jax.numpy as jnp
from jax import lax
from jax.experimental import pallas as pl
from jax.experimental.pallas import tpu as pltpu

_LANE = 128


# ------------------------------------------------------------------ parameters
def make_pe(n_dim: int) -> jnp.ndarray:
    """pe[i] = sin(i * exp(-i*ln(1e4)/n_dim)) if i even else cos(...)."""
    i = jnp.arange(n_dim)
    div_term = jnp.exp(i.astype(jnp.float32) * (-math.log(10000.0) / n_dim))
    vals = i.astype(jnp.float32) * div_term
    pe = jnp.where(i % 2 == 0, jnp.sin(vals), jnp.cos(vals))
    return pe.astype(jnp.float32)              # shape (n_dim,)


# --------------------------------------------------------------------- kernels
def _pe_eval_kernel(x_ref, pe_ref, o_ref):
    # x_ref: (TR, TC) tile, pe_ref: (1, TC) tile; pe broadcasts implicitly.
    # Dropout in eval mode == identity (matches nn.Dropout.eval()).
    o_ref[...] = (x_ref[...].astype(jnp.float32) * pe_ref[...]).astype(o_ref.dtype)


def _pe_train_kernel(seed_ref, x_ref, pe_ref, o_ref, *,
                     threshold24, tr, tc, total_cols):
    # pe already carries the 1/(1-p) inverted-dropout scale (folded in wrapper).
    y = x_ref[...].astype(jnp.float32) * pe_ref[...]

    # Stateless counter-based PRNG: murmur3-style finalizer over the global
    # element index mixed with the user seed.  Pure uint32 VPU ops -> works on
    # TPU and in interpret mode, fully decorrelated across blocks.
    r = pl.program_id(0) * tr + lax.broadcasted_iota(jnp.int32, (tr, tc), 0)
    c = pl.program_id(1) * tc + lax.broadcasted_iota(jnp.int32, (tr, tc), 1)
    idx = (r * total_cols + c).astype(jnp.uint32)

    seed_u = seed_ref[0].astype(jnp.uint32)
    h = idx ^ (seed_u * jnp.uint32(0x9E3779B1))
    h = h ^ (h >> 16)
    h = h * jnp.uint32(0x85EBCA6B)
    h = h ^ (h >> 13)
    h = h * jnp.uint32(0xC2B2AE35)
    h = h ^ (h >> 16)

    # Keep test on the low 24 bits (exactly representable as positive int32).
    keep = (h & jnp.uint32(0x00FFFFFF)).astype(jnp.int32) >= jnp.int32(threshold24)
    o_ref[...] = jnp.where(keep, y, 0.0).astype(o_ref.dtype)


# ------------------------------------------------------------------ tile sizing
def _sublane_multiple(elem_bytes: int) -> int:
    return {4: 8, 2: 16, 1: 32}.get(elem_bytes, 8)


def _lane_dense_view(total: int, D: int, elem_bytes: int,
                     col_target_bytes: int = 512 * 1024):
    """Pick (rows, cols) with cols a multiple of lcm(D, 128) dividing `total`
    (so pe tiles cleanly and stores are unmasked).  Falls back to (total//D, D)
    when no such factorization exists (masked stores, still correct)."""
    L = math.lcm(D, _LANE)
    if total % L == 0:
        m = total // L
        max_d = max(1, (col_target_bytes // elem_bytes) // L)
        d = 1
        for cand in range(min(m, max_d), 0, -1):
            if m % cand == 0:
                d = cand
                break
        cols = L * d
        return total // cols, cols
    # TODO(synk): non-lane-dense fallback (e.g. total not a multiple of 128)
    #             lowers output writes to masked vst.msk stores.
    return total // D, D


def _choose_col_tile(cols: int, elem_bytes: int,
                     max_col_bytes: int = 2 * 1024 * 1024) -> int:
    """Keep the column axis degenerate (contiguous DMA) when the full row fits
    the byte cap; otherwise pick the largest lane-dense divisor under the cap."""
    if cols * elem_bytes <= max_col_bytes or cols % _LANE != 0:
        return cols
    cap = max(_LANE, ((max_col_bytes // elem_bytes) // _LANE) * _LANE)
    tc = cap
    while tc >= _LANE:
        if cols % tc == 0:
            return tc
        tc -= _LANE
    return cols


def _choose_row_tile(rows: int, tc: int, elem_bytes: int, sublane: int,
                     target_bytes: int = 2 * 1024 * 1024) -> int:
    """Row tile sized so one tile stays ~target_bytes; with double-buffered
    input + output the footprint is ~4x that (safe under v5e's 16 MiB scoped
    VMEM and v7x's 32 MiB)."""
    max_rows = max(1, target_bytes // max(1, tc * elem_bytes))
    if rows <= max_rows:
        return rows                             # full extent: always legal
    tr = max((max_rows // sublane) * sublane, sublane)
    cand = tr
    while cand >= sublane:                      # prefer a divisor (no partial blocks)
        if rows % cand == 0:
            return cand
        cand -= sublane
    return tr                                   # boundary block masked by Pallas


# --------------------------------------------------------------------- wrapper
def positional_encoder_forward(x, pe, *, p: float = 0.1, train: bool = False,
                               seed: int = 0, allow_xla_fallback: bool = False):
    """x: (B, S, D), pe: (D,) float32 -> (B, S, D) in x.dtype."""
    B, S, D = x.shape
    out_dtype = x.dtype
    elem_bytes = jnp.dtype(x.dtype).itemsize
    sublane = _sublane_multiple(elem_bytes)
    pe_f32 = pe.astype(jnp.float32)

    apply_dropout = train and p > 0.0
    if train and p >= 1.0:                      # everything dropped; avoid 1/(1-p)
        return jnp.zeros_like(x)

    # Tiny / eval-only escape hatch: the grid is a sequential loop (~0.35 us/step
    # + launch overhead); a bare multiply fuses better in XLA.  Off by default so
    # the demo exercises the kernel.
    if allow_xla_fallback and not apply_dropout and x.size * elem_bytes < (4 << 20):
        return (x.astype(jnp.float32) * pe_f32.reshape(1, 1, D)).astype(out_dtype)

    rows, cols = _lane_dense_view(B * S * D, D, elem_bytes)
    x2 = x.reshape(rows, cols)
    pe_row = jnp.tile(pe_f32, cols // D).reshape(1, cols)
    if apply_dropout:
        # Fold inverted-dropout scale into the tiny pe row (O(cols) wrapper work).
        pe_row = pe_row * jnp.float32(1.0 / (1.0 - p))

    tc = _choose_col_tile(cols, elem_bytes)
    tr = _choose_row_tile(rows, tc, elem_bytes, sublane)
    grid = (pl.cdiv(rows, tr), pl.cdiv(cols, tc))

    out_shape = jax.ShapeDtypeStruct((rows, cols), out_dtype)
    cparams = pltpu.CompilerParams(
        dimension_semantics=("parallel", "parallel"),
        vmem_limit_bytes=32 * 1024 * 1024)

    if not apply_dropout:
        out2 = pl.pallas_call(
            _pe_eval_kernel,
            out_shape=out_shape,
            grid=grid,
            in_specs=[pl.BlockSpec((tr, tc), lambda r, c: (r, c)),
                      pl.BlockSpec((1, tc), lambda r, c: (0, c))],
            out_specs=pl.BlockSpec((tr, tc), lambda r, c: (r, c)),
            compiler_params=cparams,
        )(x2, pe_row)
    else:
        threshold24 = min(int(round(p * (1 << 24))), (1 << 24) - 1)
        kern = functools.partial(_pe_train_kernel, threshold24=threshold24,
                                 tr=tr, tc=tc, total_cols=cols)
        grid_spec = pltpu.PrefetchScalarGridSpec(
            num_scalar_prefetch=1,
            grid=grid,
            in_specs=[pl.BlockSpec((tr, tc), lambda r, c, s: (r, c)),
                      pl.BlockSpec((1, tc), lambda r, c, s: (0, c))],
            out_specs=pl.BlockSpec((tr, tc), lambda r, c, s: (r, c)))
        out2 = pl.pallas_call(
            kern,
            out_shape=out_shape,
            grid_spec=grid_spec,
            compiler_params=cparams,
        )(jnp.array([seed], dtype=jnp.int32), x2, pe_row)

    return out2.reshape(B, S, D)


# ------------------------------------------------------------------------ main
if __name__ == "__main__":
    B, S, D = 2, 8, 32          # batch, seq, n_dim (small, consistent w/ module)
    key = jax.random.PRNGKey(0)
    x = jax.random.normal(key, (B, S, D), dtype=jnp.float32)

    pe = make_pe(D)
    ref = x * pe.reshape(1, 1, D)

    # Eval-mode forward (deterministic; nn.Dropout is identity in eval).
    out_eval = jax.block_until_ready(
        positional_encoder_forward(x, pe, p=0.1, train=False))
    assert out_eval.shape == (B, S, D)
    assert jnp.allclose(out_eval, ref, atol=1e-6, rtol=1e-6)

    # bf16 I/O path (half the HBM traffic; compute upcast to f32 in-kernel).
    x_bf = x.astype(jnp.bfloat16)
    out_bf = jax.block_until_ready(
        positional_encoder_forward(x_bf, pe, p=0.1, train=False))
    ref_bf = (x_bf.astype(jnp.float32) * pe.reshape(1, 1, D)).astype(jnp.bfloat16)
    assert out_bf.dtype == jnp.bfloat16
    assert jnp.allclose(out_bf.astype(jnp.float32), ref_bf.astype(jnp.float32),
                        atol=1e-2, rtol=1e-2)

    # Train-mode forward: fused multiply + dropout in one HBM pass.
    p = 0.1
    out_train = jax.block_until_ready(
        positional_encoder_forward(x, pe, p=p, train=True, seed=1234))
    scaled = ref / (1.0 - p)
    kept = out_train != 0.0                     # kept elements must equal ref/(1-p)
    assert jnp.allclose(jnp.where(kept, out_train, scaled), scaled,
                        atol=1e-5, rtol=1e-5)
    n_drop = int(jnp.sum(~kept))
    drop_rate = n_drop / kept.size
    assert 0 < n_drop < kept.size
    assert abs(drop_rate - p) < 0.2             # loose statistical sanity check

    print("KERNEL_OK")
</pallas_src>

<mosaic_0001>
module attributes {stable_mosaic.version = 11 : i64} {
  func.func @_pe_eval_kernel(%arg0: i32, %arg1: i32, %arg2: memref<1x512xf32, #tpu.memory_space<vmem>>, %arg3: memref<1x512xf32, #tpu.memory_space<vmem>>, %arg4: memref<1x512xf32, #tpu.memory_space<vmem>>) attributes {dimension_semantics = [#tpu.dimension_semantics<parallel>, #tpu.dimension_semantics<parallel>], iteration_bounds = array<i64: 1, 1>, scalar_prefetch = 0 : i64, scratch_operands = 0 : i64, tpu.core_type = #tpu.core_type<tc>, window_params = [{transform_indices = @transform_0, window_bounds = array<i64: 1, 512>}, {transform_indices = @transform_1, window_bounds = array<i64: 1, 512>}, {transform_indices = @transform_2, window_bounds = array<i64: 1, 512>}]} {
    %c0 = arith.constant 0 : index
    %c0_0 = arith.constant 0 : index
    %0 = vector.load %arg2[%c0, %c0_0] : memref<1x512xf32, #tpu.memory_space<vmem>>, vector<1x512xf32>
    %c0_1 = arith.constant 0 : index
    %c0_2 = arith.constant 0 : index
    %1 = vector.load %arg3[%c0_1, %c0_2] : memref<1x512xf32, #tpu.memory_space<vmem>>, vector<1x512xf32>
    %2 = arith.mulf %0, %1 : vector<1x512xf32>
    %c0_3 = arith.constant 0 : index
    %c0_4 = arith.constant 0 : index
    %3 = vector.load %arg4[%c0_3, %c0_4] : memref<1x512xf32, #tpu.memory_space<vmem>>, vector<1x512xf32>
    tpu.vector_store %arg4[%c0_3, %c0_4], %2 {strides = array<i32>} : memref<1x512xf32, #tpu.memory_space<vmem>>, vector<1x512xf32>,
    return
  }
  func.func @transform_0(%arg0: i32, %arg1: i32) -> (i32, i32) {
    %c0_i32 = arith.constant 0 : i32
    return %arg0, %arg1 : i32, i32
  }
  func.func @transform_1(%arg0: i32, %arg1: i32) -> (i32, i32) {
    %c0_i32 = arith.constant 0 : i32
    %c0_i32_0 = arith.constant 0 : i32
    return %c0_i32, %arg1 : i32, i32
  }
  func.func @transform_2(%arg0: i32, %arg1: i32) -> (i32, i32) {
    %c0_i32 = arith.constant 0 : i32
    return %arg0, %arg1 : i32, i32
  }
}

</mosaic_0001>

<bundles_post_ra>
// kernel: tpu_custom_call.1
= control target key start
LH: loop header
LB: loop body
LE: loop exit
PB: predicated region body
PF: predicated region fallthrough
CT: control target
= control target key end

     0   :  { %7 = vsyncpa [#allocation3], 0  ;;  %s189_s0 = inlined_call_operand.hbm [shape: f32[1,512], index: 0, kind: input, shape index: {}]   ;;  %s190_s1 = inlined_call_operand.hbm [shape: f32[1,512], index: 1, kind: input, shape index: {}]   ;;  %s191_s2 = inlined_call_operand.hbm [shape: f32[1,512], index: 2, kind: output, shape index: {}]  }
   0x1   :  { %8 = vsyncpa [#allocation6], 0 }
   0x2   :  { %9 = vsyncpa [#allocation4], 0  ;;  %s135_s9 = smov [#allocation2]   ;;  %s136_s11 = smov [#allocation5]  }
   0x3   :  { %s16_s10 = sshll.u32 %s135_s9, 4  ;;  %s26_s12 = sshll.u32 %s136_s11, 4  ;;  %s17_s10 = int_to_ptr.vmem [resolvable:$true] %s16_s10  ;;  %s27_s12 = int_to_ptr.vmem [resolvable:$true] %s26_s12 }
   0x4   :  { %s63_s15 = scalar_lea.hbm %s189_s0, 64 }
   0x5   :  { %p64_p0 = scmp.ne.s32.totalorder %s189_s0, %s63_s15  ;;  %p67_p1 = scmp.lt.u32.totalorder %s63_s15, %s189_s0 }
   0x7   :  { %p69_p2 = pnand %p67_p1, %p64_p0 }
   0x9   :  { %72 = shalt.err (!%p69_p2)
}
   0xa   :  { %s73_s20 = scalar_lea.vmem %s17_s10, 64  ;;  %p78_p4 = scmp.lt.s32.totalorder %s17_s10, %s17_s10 }
   0xb   :  { %p74_p3 = scmp.ne.s32.totalorder %s17_s10, %s73_s20  ;;  %p79_p5 = scmp.lt.s32.totalorder %s73_s20, %s73_s20 }
   0xd   :  { %p80_p6 = por %p79_p5, %p78_p4 }
   0xf   :  { %p81_p7 = pnand %p80_p6, %p74_p3 }
  0x11   :  { %84 = shalt.err (!%p81_p7)
}
  0x12   :  { %19 = dma.hbm_to_vmem [thread:$0]  %s189_s0, 64, %s17_s10, [#allocation3]  }
  0x13   :  { %s85_s25 = scalar_lea.hbm %s190_s1, 64 }
  0x14   :  { %p86_p8 = scmp.ne.s32.totalorder %s190_s1, %s85_s25  ;;  %p89_p9 = scmp.lt.u32.totalorder %s85_s25, %s190_s1 }
  0x16   :  { %p91_p10 = pnand %p89_p9, %p86_p8 }
  0x18   :  { %94 = shalt.err (!%p91_p10)
}
  0x19   :  { %s95_s30 = scalar_lea.vmem %s27_s12, 64  ;;  %p100_p12 = scmp.lt.s32.totalorder %s27_s12, %s27_s12 }
  0x1a   :  { %p96_p11 = scmp.ne.s32.totalorder %s27_s12, %s95_s30  ;;  %p101_p13 = scmp.lt.s32.totalorder %s95_s30, %s95_s30 }
  0x1c   :  { %p102_p0 = por %p101_p13, %p100_p12 }
  0x1e   :  { %p103_p1 = pnand %p102_p0, %p96_p11 }
  0x20   :  { %106 = shalt.err (!%p103_p1)
}
  0x21   :  { %29 = dma.hbm_to_vmem [thread:$0]  %s190_s1, 64, %s27_s12, [#allocation6]  }
  0x22   :  { %129 = dma.done.wait [#allocation3], 64  }
  0x23   :  { %130 = vsyncadd [#allocation3], 4294967232 }
  0x24   :  { %131 = dma.done.wait [#allocation6], 64  }
  0x25   :  { %132 = vsyncadd [#allocation6], 4294967232  ;;  %v39_v0 = vlaneseq  ;;  %s137_s4 = smov [#allocation7]   ;;  %v36_v1 = vld [vmem:[#allocation2] sm:$0xf] }
  0x26   :  { %s50_s5 = sshll.u32 %s137_s4, 4  ;;  %v37_v2 = vld [vmem:[#allocation5] sm:$0xf]  ;;  %s51_s5 = int_to_ptr.vmem [resolvable:$true] %s50_s5 }
  0x27   :  { %vm41_vm0 = vcmp.lt.s32.totalorder %v39_v0, 512  ;;  %v38_v3 = vmul.f32 %v37_v2, %v36_v1  ;;  %s107_s6 = scalar_lea.vmem %s51_s5, 64  ;;  %p112_p3 = scmp.lt.s32.totalorder %s51_s5, %s51_s5 }
  0x28   :  { %p108_p2 = scmp.ne.s32.totalorder %s51_s5, %s107_s6  ;;  %p113_p4 = scmp.lt.s32.totalorder %s107_s6, %s107_s6 }
  0x29   :  { %43 = vst.msk [vmem:[#allocation7] sm:$0xf] %vm41_vm0, %v38_v3 }
  0x2a   :  { %p114_p5 = por %p113_p4, %p112_p3 }
  0x2c   :  { %p115_p6 = pnand %p114_p5, %p108_p2 }
  0x2e   :  { %118 = shalt.err (!%p115_p6)
}
  0x2f   :  { %s119_s8 = scalar_lea.hbm %s191_s2, 64 }
  0x30   :  { %p120_p7 = scmp.ne.s32.totalorder %s191_s2, %s119_s8  ;;  %p123_p8 = scmp.lt.u32.totalorder %s119_s8, %s191_s2 }
  0x32   :  { %p125_p9 = pnand %p123_p8, %p120_p7 }
  0x34   :  { %128 = shalt.err (!%p125_p9)
}
  0x35   :  { %53 = dma.vmem_to_hbm [thread:$0]  %s51_s5, 64, %s191_s2, [#allocation4]  }
  0x36   :  { %133 = dma.done.wait [#allocation4], 64  }
  0x37   :  { %134 = vsyncadd [#allocation4], 4294967232 }
  0x38   :  { %57 = vsyncpa [#allocation3], 1 }
  0x39   :  { %58 = vsyncpa [#allocation6], 1 }
  0x3a   :  { %59 = vsyncpa [#allocation4], 1 }

</bundles_post_ra>
